<compile_context>
chip_gen: v7x
topology: tpu7x:2x2x1
jax: 0.10.0
libtpu: 0.0.40
codegen_flags: <defaults>
</compile_context>

<pallas_src>
import jax
import jax.numpy as jnp
from jax.experimental import pallas as pl
from jax.experimental.pallas import tpu as pltpu

EPS = 1e-7
_LANES = 128
# sigmoid(-1e9) == 0.0 exactly, so padded logits contribute nothing to o_sum /
# intersection.  (Zero-padding would be WRONG: sigmoid(0) = 0.5 per pad elem.)
_PAD_LOGIT = -1e9


def _round_up(x, m):
    return ((x + m - 1) // m) * m


def _dice_kernel(out_ref, tgt_ref, sums_ref, acc_o, acc_t, acc_i):
    """One (TR, 128) tile per grid step.

    out_ref / tgt_ref : (TR, 128) auto-pipelined input tiles (logits / targets).
    sums_ref          : (3,) f32 SMEM output = [o_sum, t_sum, intersection].
    acc_o/acc_t/acc_i : (TR, 128) f32 VMEM accumulators, persistent over grid.
    """
    i = pl.program_id(0)

    @pl.when(i == 0)
    def _init():
        acc_o[...] = jnp.zeros_like(acc_o)
        acc_t[...] = jnp.zeros_like(acc_t)
        acc_i[...] = jnp.zeros_like(acc_i)

    o = jax.nn.sigmoid(out_ref[...].astype(jnp.float32))   # torch.sigmoid(output)
    t = tgt_ref[...].astype(jnp.float32)

    # Pure VPU adds per tile — keeps the inner loop DMA-bound and co-issues
    # with the HBM fetch of tile i+1 (no per-tile XLU reductions).
    acc_o[...] += o
    acc_t[...] += t
    acc_i[...] += o * t

    # Single cross-lane (XLU) reduction, only on the last grid step.
    @pl.when(i == pl.num_programs(0) - 1)
    def _finalize():
        sums_ref[0] = jnp.sum(acc_o[...])
        sums_ref[1] = jnp.sum(acc_t[...])
        sums_ref[2] = jnp.sum(acc_i[...])


def _dice_sums(out2d, tgt2d, tile_rows):
    rows = out2d.shape[0]
    num_tiles = rows // tile_rows
    return pl.pallas_call(
        _dice_kernel,
        out_shape=jax.ShapeDtypeStruct((3,), jnp.float32),
        grid_spec=pltpu.PrefetchScalarGridSpec(
            num_scalar_prefetch=0,
            grid=(num_tiles,),
            in_specs=[
                pl.BlockSpec((tile_rows, _LANES), lambda i: (i, 0)),
                pl.BlockSpec((tile_rows, _LANES), lambda i: (i, 0)),
            ],
            out_specs=pl.BlockSpec(memory_space=pltpu.SMEM),
            scratch_shapes=[
                pltpu.VMEM((tile_rows, _LANES), jnp.float32),
                pltpu.VMEM((tile_rows, _LANES), jnp.float32),
                pltpu.VMEM((tile_rows, _LANES), jnp.float32),
            ],
        ),
        compiler_params=pltpu.CompilerParams(
            dimension_semantics=("arbitrary",)),  # reduction axis
        # TODO(synk): on v7x, add a leading size-2 "parallel"/core_map axis so
        # both TensorCores each reduce half the tensor into separate partials.
    )(out2d, tgt2d)


def dice_loss(output, target, verbose=True, tile_rows=1024):
    """Matches DiceLoss.forward: returns the scalar dice loss (float32).

    tile_rows=1024 -> 512 KiB f32 per input buffer (double-buffered) plus
    1.5 MiB of accumulator scratch: fixed VMEM footprint on all generations.
    """
    assert output.shape == target.shape
    total = output.size

    # Lane-dense (rows, 128) slab, padded so rows is a multiple of the tile.
    rows = pl.cdiv(total, _LANES)
    tr = _round_up(min(tile_rows, _round_up(rows, 8)), 8)
    rows_pad = _round_up(rows, tr)
    pad = rows_pad * _LANES - total

    out_flat = output.reshape(-1)
    tgt_flat = target.reshape(-1)
    if pad:
        out_flat = jnp.pad(out_flat, (0, pad), constant_values=_PAD_LOGIT)
        tgt_flat = jnp.pad(tgt_flat, (0, pad), constant_values=0)

    out2d = out_flat.reshape(rows_pad, _LANES)
    tgt2d = tgt_flat.reshape(rows_pad, _LANES)

    sums = _dice_sums(out2d, tgt2d, tr)
    o_sum, t_sum, intersection = sums[0], sums[1], sums[2]
    dice_coeff = 2.0 * intersection / (o_sum + t_sum + EPS)
    loss = 1.0 - dice_coeff

    if verbose:
        # Debug-only path mirroring the PyTorch module's prints.  Min/max are
        # computed with plain jnp here (not in the hot kernel), and the host
        # sync only happens when verbose is requested.  Not jit-safe.
        o = jax.nn.sigmoid(output.astype(jnp.float32))
        print('Output Min:', float(jnp.min(o)), 'Max:', float(jnp.max(o)))
        print('Target Min:', float(jnp.min(target)), 'Max:',
              float(jnp.max(target)))
        print('Intersection:', float(intersection))
        print('Dice Coefficient:', float(dice_coeff))
        print('Output Sum:', float(o_sum))
        print('Target Sum:', float(t_sum))

    return loss


if __name__ == "__main__":
    key = jax.random.PRNGKey(0)
    k_out, k_tgt = jax.random.split(key)

    # Small NCHW shapes consistent with a segmentation-style use of DiceLoss.
    x_shape = (2, 4, 16, 16)
    output = jax.random.normal(k_out, x_shape, dtype=jnp.float32)            # logits
    target = (jax.random.uniform(k_tgt, x_shape) > 0.5).astype(jnp.float32)  # mask

    loss = dice_loss(output, target, verbose=False)
    loss = jax.block_until_ready(loss)

    # Reference check (pure JAX).
    o = jax.nn.sigmoid(output)
    inter = jnp.sum(o * target)
    ref = 1.0 - 2.0 * inter / (jnp.sum(o) + jnp.sum(target) + EPS)
    assert jnp.allclose(loss, ref, rtol=1e-5, atol=1e-5), (loss, ref)

    print("KERNEL_OK")
</pallas_src>

<mosaic_0001>
module attributes {stable_mosaic.version = 11 : i64} {
  func.func @_dice_kernel(%arg0: i32, %arg1: memref<16x128xf32, #tpu.memory_space<vmem>>, %arg2: memref<16x128xf32, #tpu.memory_space<vmem>>, %arg3: memref<3xf32, #tpu.memory_space<smem>>, %arg4: memref<16x128xf32, #tpu.memory_space<vmem>>, %arg5: memref<16x128xf32, #tpu.memory_space<vmem>>, %arg6: memref<16x128xf32, #tpu.memory_space<vmem>>) attributes {dimension_semantics = [#tpu.dimension_semantics<arbitrary>], iteration_bounds = array<i64: 1>, scalar_prefetch = 0 : i64, scratch_operands = 3 : i64, tpu.core_type = #tpu.core_type<tc>, window_params = [{transform_indices = @transform_0, window_bounds = array<i64: 16, 128>}, {transform_indices = @transform_1, window_bounds = array<i64: 16, 128>}, {transform_indices = @transform_2, window_bounds = array<i64: 3>}]} {
    %c0_i32 = arith.constant 0 : i32
    %0 = arith.cmpi eq, %arg0, %c0_i32 : i32
    %1 = arith.extui %0 : i1 to i32
    %c0_i32_0 = arith.constant 0 : i32
    %2 = arith.cmpi ne, %1, %c0_i32_0 : i32
    scf.if %2 {
      %cst_18 = arith.constant 0.000000e+00 : f32
      %23 = vector.broadcast %cst_18 : f32 to vector<16x128xf32>
      %c0_19 = arith.constant 0 : index
      %c0_20 = arith.constant 0 : index
      %24 = vector.load %arg4[%c0_19, %c0_20] : memref<16x128xf32, #tpu.memory_space<vmem>>, vector<16x128xf32>
      tpu.vector_store %arg4[%c0_19, %c0_20], %23 {strides = array<i32>} : memref<16x128xf32, #tpu.memory_space<vmem>>, vector<16x128xf32>,
      %cst_21 = arith.constant 0.000000e+00 : f32
      %25 = vector.broadcast %cst_21 : f32 to vector<16x128xf32>
      %c0_22 = arith.constant 0 : index
      %c0_23 = arith.constant 0 : index
      %26 = vector.load %arg5[%c0_22, %c0_23] : memref<16x128xf32, #tpu.memory_space<vmem>>, vector<16x128xf32>
      tpu.vector_store %arg5[%c0_22, %c0_23], %25 {strides = array<i32>} : memref<16x128xf32, #tpu.memory_space<vmem>>, vector<16x128xf32>,
      %cst_24 = arith.constant 0.000000e+00 : f32
      %27 = vector.broadcast %cst_24 : f32 to vector<16x128xf32>
      %c0_25 = arith.constant 0 : index
      %c0_26 = arith.constant 0 : index
      %28 = vector.load %arg6[%c0_25, %c0_26] : memref<16x128xf32, #tpu.memory_space<vmem>>, vector<16x128xf32>
      tpu.vector_store %arg6[%c0_25, %c0_26], %27 {strides = array<i32>} : memref<16x128xf32, #tpu.memory_space<vmem>>, vector<16x128xf32>,
    } else {
    }
    %c0 = arith.constant 0 : index
    %c0_1 = arith.constant 0 : index
    %3 = vector.load %arg1[%c0, %c0_1] : memref<16x128xf32, #tpu.memory_space<vmem>>, vector<16x128xf32>
    %4 = arith.negf %3 : vector<16x128xf32>
    %5 = math.exp %4 : vector<16x128xf32>
    %cst = arith.constant 1.000000e+00 : f32
    %6 = vector.broadcast %cst : f32 to vector<16x128xf32>
    %7 = arith.addf %6, %5 : vector<16x128xf32>
    %8 = arith.divf %6, %7 : vector<16x128xf32>
    %c0_2 = arith.constant 0 : index
    %c0_3 = arith.constant 0 : index
    %9 = vector.load %arg2[%c0_2, %c0_3] : memref<16x128xf32, #tpu.memory_space<vmem>>, vector<16x128xf32>
    %c0_4 = arith.constant 0 : index
    %c0_5 = arith.constant 0 : index
    %10 = vector.load %arg4[%c0_4, %c0_5] : memref<16x128xf32, #tpu.memory_space<vmem>>, vector<16x128xf32>
    %11 = arith.addf %10, %8 : vector<16x128xf32>
    %c0_6 = arith.constant 0 : index
    %c0_7 = arith.constant 0 : index
    %12 = vector.load %arg4[%c0_6, %c0_7] : memref<16x128xf32, #tpu.memory_space<vmem>>, vector<16x128xf32>
    tpu.vector_store %arg4[%c0_6, %c0_7], %11 {strides = array<i32>} : memref<16x128xf32, #tpu.memory_space<vmem>>, vector<16x128xf32>,
    %c0_8 = arith.constant 0 : index
    %c0_9 = arith.constant 0 : index
    %13 = vector.load %arg5[%c0_8, %c0_9] : memref<16x128xf32, #tpu.memory_space<vmem>>, vector<16x128xf32>
    %14 = arith.addf %13, %9 : vector<16x128xf32>
    %c0_10 = arith.constant 0 : index
    %c0_11 = arith.constant 0 : index
    %15 = vector.load %arg5[%c0_10, %c0_11] : memref<16x128xf32, #tpu.memory_space<vmem>>, vector<16x128xf32>
    tpu.vector_store %arg5[%c0_10, %c0_11], %14 {strides = array<i32>} : memref<16x128xf32, #tpu.memory_space<vmem>>, vector<16x128xf32>,
    %c0_12 = arith.constant 0 : index
    %c0_13 = arith.constant 0 : index
    %16 = vector.load %arg6[%c0_12, %c0_13] : memref<16x128xf32, #tpu.memory_space<vmem>>, vector<16x128xf32>
    %17 = arith.mulf %8, %9 : vector<16x128xf32>
    %18 = arith.addf %16, %17 : vector<16x128xf32>
    %c0_14 = arith.constant 0 : index
    %c0_15 = arith.constant 0 : index
    %19 = vector.load %arg6[%c0_14, %c0_15] : memref<16x128xf32, #tpu.memory_space<vmem>>, vector<16x128xf32>
    tpu.vector_store %arg6[%c0_14, %c0_15], %18 {strides = array<i32>} : memref<16x128xf32, #tpu.memory_space<vmem>>, vector<16x128xf32>,
    %c0_i32_16 = arith.constant 0 : i32
    %20 = arith.cmpi eq, %arg0, %c0_i32_16 : i32
    %21 = arith.extui %20 : i1 to i32
    %c0_i32_17 = arith.constant 0 : i32
    %22 = arith.cmpi ne, %21, %c0_i32_17 : i32
    scf.if %22 {
      %c0_18 = arith.constant 0 : index
      %c0_19 = arith.constant 0 : index
      %23 = vector.load %arg4[%c0_18, %c0_19] : memref<16x128xf32, #tpu.memory_space<vmem>>, vector<16x128xf32>
      %24 = vector.shape_cast %23 : vector<16x128xf32> to vector<1x16x128xf32>
      %cst_20 = arith.constant dense<0.000000e+00> : vector<1xf32>
      %25 = vector.multi_reduction <add>, %24, %cst_20 [1, 2] : vector<1x16x128xf32> to vector<1xf32>
      %26 = vector.shape_cast %25 : vector<1xf32> to vector<1x1x1xf32>
      %27 = vector.extract %26[0, 0, 0] : f32 from vector<1x1x1xf32>
      %c0_21 = arith.constant 0 : index
      %28 = memref.load %arg3[%c0_21] : memref<3xf32, #tpu.memory_space<smem>>
      memref.store %27, %arg3[%c0_21] : memref<3xf32, #tpu.memory_space<smem>>
      %c0_22 = arith.constant 0 : index
      %c0_23 = arith.constant 0 : index
      %29 = vector.load %arg5[%c0_22, %c0_23] : memref<16x128xf32, #tpu.memory_space<vmem>>, vector<16x128xf32>
      %30 = vector.shape_cast %29 : vector<16x128xf32> to vector<1x16x128xf32>
      %cst_24 = arith.constant dense<0.000000e+00> : vector<1xf32>
      %31 = vector.multi_reduction <add>, %30, %cst_24 [1, 2] : vector<1x16x128xf32> to vector<1xf32>
      %32 = vector.shape_cast %31 : vector<1xf32> to vector<1x1x1xf32>
      %33 = vector.extract %32[0, 0, 0] : f32 from vector<1x1x1xf32>
      %c1 = arith.constant 1 : index
      %34 = memref.load %arg3[%c1] : memref<3xf32, #tpu.memory_space<smem>>
      memref.store %33, %arg3[%c1] : memref<3xf32, #tpu.memory_space<smem>>
      %c0_25 = arith.constant 0 : index
      %c0_26 = arith.constant 0 : index
      %35 = vector.load %arg6[%c0_25, %c0_26] : memref<16x128xf32, #tpu.memory_space<vmem>>, vector<16x128xf32>
      %36 = vector.shape_cast %35 : vector<16x128xf32> to vector<1x16x128xf32>
      %cst_27 = arith.constant dense<0.000000e+00> : vector<1xf32>
      %37 = vector.multi_reduction <add>, %36, %cst_27 [1, 2] : vector<1x16x128xf32> to vector<1xf32>
      %38 = vector.shape_cast %37 : vector<1xf32> to vector<1x1x1xf32>
      %39 = vector.extract %38[0, 0, 0] : f32 from vector<1x1x1xf32>
      %c2 = arith.constant 2 : index
      %40 = memref.load %arg3[%c2] : memref<3xf32, #tpu.memory_space<smem>>
      memref.store %39, %arg3[%c2] : memref<3xf32, #tpu.memory_space<smem>>
    } else {
    }
    return
  }
  func.func @transform_0(%arg0: i32) -> (i32, i32) {
    %c0_i32 = arith.constant 0 : i32
    %c0_i32_0 = arith.constant 0 : i32
    return %arg0, %c0_i32 : i32, i32
  }
  func.func @transform_1(%arg0: i32) -> (i32, i32) {
    %c0_i32 = arith.constant 0 : i32
    %c0_i32_0 = arith.constant 0 : i32
    return %arg0, %c0_i32 : i32, i32
  }
  func.func @transform_2(%arg0: i32) -> i32 {
    %c0_i32 = arith.constant 0 : i32
    %c0_i32_0 = arith.constant 0 : i32
    return %c0_i32 : i32
  }
}

</mosaic_0001>

<bundles_post_ra>
// kernel: tpu_custom_call.1
= control target key start
LH: loop header
LB: loop body
LE: loop exit
PB: predicated region body
PF: predicated region fallthrough
CT: control target
= control target key end

     0   :  { %7 = vsyncpa [#allocation6], 0  ;;  %s283_s0 = inlined_call_operand.hbm [shape: f32[16,128], index: 0, kind: input, shape index: {}]   ;;  %s284_s1 = inlined_call_operand.hbm [shape: f32[16,128], index: 1, kind: input, shape index: {}]   ;;  %s285_s2 = inlined_call_operand.hbm [shape: f32[3], index: 2, kind: output, shape index: {}]  }
   0x1   :  { %8 = vsyncpa [#allocation9], 0 }
   0x2   :  { %9 = vsyncpa [#allocation7], 0  ;;  %s227_s9 = smov [#allocation5]   ;;  %s167_s13 = scalar_lea.hbm %s283_s0, 256 }
   0x3   :  { %s15_s10 = sshll.u32 %s227_s9, 4  ;;  %p168_p0 = scmp.ne.s32.totalorder %s283_s0, %s167_s13  ;;  %s16_s10 = int_to_ptr.vmem [resolvable:$true] %s15_s10 }
   0x4   :  { %p171_p1 = scmp.lt.u32.totalorder %s167_s13, %s283_s0 }
   0x6   :  { %p173_p2 = pnand %p171_p1, %p168_p0 }
   0x8   :  { %176 = shalt.err (!%p173_p2)
}
   0x9   :  { %s177_s18 = scalar_lea.vmem %s16_s10, 256  ;;  %p182_p4 = scmp.lt.s32.totalorder %s16_s10, %s16_s10 }
   0xa   :  { %p178_p3 = scmp.ne.s32.totalorder %s16_s10, %s177_s18  ;;  %p183_p5 = scmp.lt.s32.totalorder %s177_s18, %s177_s18 }
   0xc   :  { %p184_p6 = por %p183_p5, %p182_p4 }
   0xe   :  { %p185_p7 = pnand %p184_p6, %p178_p3 }
  0x10   :  { %188 = shalt.err (!%p185_p7)
}
  0x11   :  { %s228_s19 = smov 128   ;;  %s229_s20 = smov 8  }
  0x12   :  { %21 = dma.hbm_to_vmem [thread:$0]  %s283_s0, 256, %s16_s10, [#allocation6], %s228_s19, %s228_s19, %s229_s20  }
  0x13   :  { %s230_s23 = smov [#allocation8]   ;;  %s189_s27 = scalar_lea.hbm %s284_s1, 256 }
  0x14   :  { %s27_s24 = sshll.u32 %s230_s23, 4  ;;  %p190_p8 = scmp.ne.s32.totalorder %s284_s1, %s189_s27  ;;  %s28_s24 = int_to_ptr.vmem [resolvable:$true] %s27_s24 }
  0x15   :  { %p193_p9 = scmp.lt.u32.totalorder %s189_s27, %s284_s1 }
  0x17   :  { %p195_p10 = pnand %p193_p9, %p190_p8 }
  0x19   :  { %198 = shalt.err (!%p195_p10)
}
  0x1a   :  { %s199_s4 = scalar_lea.vmem %s28_s24, 256  ;;  %p204_p12 = scmp.lt.s32.totalorder %s28_s24, %s28_s24 }
  0x1b   :  { %p200_p11 = scmp.ne.s32.totalorder %s28_s24, %s199_s4  ;;  %p205_p13 = scmp.lt.s32.totalorder %s199_s4, %s199_s4 }
  0x1d   :  { %p206_p0 = por %p205_p13, %p204_p12 }
  0x1f   :  { %p207_p1 = pnand %p206_p0, %p200_p11 }
  0x21   :  { %210 = shalt.err (!%p207_p1)
}
  0x22   :  { %33 = dma.hbm_to_vmem [thread:$0]  %s284_s1, 256, %s28_s24, [#allocation9], %s228_s19, %s228_s19, %s229_s20  }
  0x23   :  { %221 = dma.done.wait [#allocation6], 256  }
  0x24   :  { %222 = vsyncadd [#allocation6], 4294967040 }
  0x25   :  { %223 = dma.done.wait [#allocation9], 256  }
  0x26   :  { %224 = vsyncadd [#allocation9], 4294967040  ;;  %v50_v0 = vld [vmem:[#allocation5] sm:$0xff]  ;;  %v51_v1 = vld [vmem:[#allocation5 + $0x8] sm:$0xff]  ;;  %s211_s10 = scalar_lea.hbm %s285_s2, 16 }
  0x27   :  { %v146_v2 = vmul.f32 -1.442695, %v50_v0  ;;  %v147_v3 = vmul.f32 -1.442695, %v51_v1  ;;  %v64_v8 = vld [vmem:[#allocation8] sm:$0xff]  ;;  %v65_v9 = vld [vmem:[#allocation8 + $0x8] sm:$0xff]  ;;  %p212_p2 = scmp.ne.s32.totalorder %s285_s2, %s211_s10  ;;  %p215_p3 = scmp.lt.u32.totalorder %s211_s10, %s285_s2 }
  0x28   :  { %v105_v16 = vadd.f32 %v65_v9, %v64_v8 }
  0x29   :  { %159 = vpow2.f32 %v146_v2  ;;  %p217_p4 = pnand %p215_p3, %p212_p2 }
  0x2a   :  { %161 = vpow2.f32 %v147_v3 }
  0x33   :  { %v160_v4 = vpop.eup %159 }
  0x34   :  { %v162_v5 = vpop.eup %161  ;;  %v58_v6 = vadd.f32 1.0, %v160_v4 }
  0x35   :  { %v59_v7 = vadd.f32 1.0, %v162_v5 }
  0x36   :  { %163 = vrcp.f32 %v58_v6 }
  0x37   :  { %165 = vrcp.f32 %v59_v7 }
  0x40   :  { %v164_v10 = vpop.eup %163 }
  0x41   :  { %v166_v11 = vpop.eup %165  ;;  %v80_v12 = vmul.f32 %v164_v10, %v64_v8 }
  0x42   :  { %v91_v13 = vadd.f32 %v166_v11, %v164_v10  ;;  %v81_v14 = vmul.f32 %v166_v11, %v65_v9 }
  0x44   :  { %92 = vadd.xlane.f32.xlu0 %v91_v13  ;;  %v119_v15 = vadd.f32 %v81_v14, %v80_v12 }
  0x46   :  { %120 = vadd.xlane.f32.xlu1 %v119_v15 }
  0x48   :  { %106 = vadd.xlane.f32.xlu0 %v105_v16 }
  0xd1   :  { %v93_v17 = vpop.xlane.xlu0 %92 }
  0xd2   :  { %v94_v18 = vrot.slane %v93_v17, 4 }
  0xd3   :  { %v121_v19 = vpop.xlane.xlu1 %120 }
  0xd4   :  { %v95_v20 = vadd.f32 %v94_v18, %v93_v17  ;;  %v122_v21 = vrot.slane %v121_v19, 4 }
  0xd5   :  { %v107_v22 = vpop.xlane.xlu0 %106 }
  0xd6   :  { %v96_v23 = vrot.slane %v95_v20, 2  ;;  %v123_v24 = vadd.f32 %v122_v21, %v121_v19  ;;  %v108_v25 = vrot.slane %v107_v22, 4 }
  0xd8   :  { %v124_v26 = vrot.slane %v123_v24, 2  ;;  %v109_v27 = vadd.f32 %v108_v25, %v107_v22  ;;  %v97_v28 = vadd.f32 %v96_v23, %v95_v20 }
  0xda   :  { %v125_v29 = vadd.f32 %v124_v26, %v123_v24  ;;  %v110_v30 = vrot.slane %v109_v27, 2  ;;  %v98_v31 = vrot.slane %v97_v28, 1 }
  0xdc   :  { %v111_v32 = vadd.f32 %v110_v30, %v109_v27  ;;  %v99_v33 = vadd.f32 %v98_v31, %v97_v28  ;;  %v126_v34 = vrot.slane %v125_v29, 1 }
  0xde   :  { %148 = vpush %v99_v33  ;;  %v112_v35 = vrot.slane %v111_v32, 1  ;;  %v127_v37 = vadd.f32 %v126_v34, %v125_v29 }
  0xe0   :  { %v113_v36 = vadd.f32 %v112_v35, %v111_v32 }
  0xe2   :  { %150 = vpush %v113_v36 }
  0xe3   :  { %152 = vpush %v127_v37 }
 0x10f   :  { %s149_s1 = spop %148 }
 0x110   :  { %102 = sst [smem:[#allocation10]] %s149_s1 }
 0x113   :  { %s151_s6 = spop %150 }
 0x114   :  { %116 = sst [smem:[#allocation10 + $0x1]] %s151_s6  ;;  %s153_s7 = spop %152 }
 0x115   :  { %130 = sst [smem:[#allocation10 + $0x2]] %s153_s7 }
 0x116   :  { %220 = shalt.err (!%p217_p4)
}
 0x117   :  { %s231_s15 = smov [#allocation10]  }
 0x118   :  { %138 = dma.smem_to_hbm %s231_s15, 16, %s285_s2, [#allocation7]  }
 0x119   :  { %225 = dma.done.wait [#allocation7], 16  }
 0x11a   :  { %226 = vsyncadd [#allocation7], 4294967280 }
 0x11b   :  { %142 = sfence }
 0x11c   :  { %143 = vsyncpa [#allocation6], 1 }
 0x11d   :  { %144 = vsyncpa [#allocation9], 1 }
 0x11e   :  { %145 = vsyncpa [#allocation7], 1 }

</bundles_post_ra>
